<compile_context>
chip_gen: v6e
topology: v6e:2x2x1
jax: 0.10.0
libtpu: 0.0.40
codegen_flags: <defaults>
</compile_context>

<pallas_src>
import functools
import math

import jax
import jax.numpy as jnp
from jax.experimental import pallas as pl
from jax.experimental.pallas import tpu as pltpu

LOG2 = math.log(2.0)
OUT_LANES = 128          # lane-dense output block width


def _shifted_softplus(x):
    # softplus(x) - log(2), numerically stable.
    return jnp.maximum(x, 0.0) + jnp.log1p(jnp.exp(-jnp.abs(x))) - LOG2


def _round_up(x, m):
    return -(-x // m) * m


def ese_kernel(rep_ref, w_ref, w1_ref, b1_ref, w2r_ref, b2_ref, y_ref, *, tb, ap):
    # rep_ref : (tb*ap, F)  flattened (batch, atom) rows, features on lanes
    # w_ref   : (tb*ap, 1)  per-atom weight = atom_mask * ||R||^2
    # w1_ref  : (F, H), b1_ref: (1, H), w2r_ref: (1, H) = W2^T
    # b2_ref  : (1, 1) scalar in SMEM
    # y_ref   : (tb, OUT_LANES) per-batch result broadcast across lanes
    h = jnp.dot(rep_ref[...], w1_ref[...], preferred_element_type=jnp.float32)
    h = _shifted_softplus(h + b1_ref[...])                                   # (R, H)

    # Second Dense (H -> 1) as VPU multiply + lane reduce instead of an N=1 matmul.
    q = jnp.sum(h * w2r_ref[...], axis=1, keepdims=True) + b2_ref[0, 0]      # (R, 1)

    yi = q * w_ref[...]                                                      # (R, 1)

    # Sum the ap atoms of each batch element (ap is a multiple of 8 so this reshape is a
    # tile-aligned regrouping of whole (8,128) tiles).
    y_col = jnp.sum(yi.reshape(tb, ap, 1), axis=1)                           # (tb, 1)

    # Lane-dense store (unmasked full-width vst); wrapper keeps column 0.
    y_ref[...] = jnp.broadcast_to(y_col, (tb, OUT_LANES)).astype(y_ref.dtype)


def electronic_spatial_extent(representation, positions, atom_mask, w1, b1, w2, b2,
                              *, batch_tile=None):
    B, A, F = representation.shape
    H = w1.shape[1]
    f32 = jnp.float32

    A_p = _round_up(A, 8)                      # pad atoms to a sublane multiple

    if batch_tile is None:
        bytes_per_batch = A_p * F * 4
        tb_cap = max(1, (2 << 20) // bytes_per_batch)       # ~2 MiB rep tile per buffer
        tb_cap = min(tb_cap, max(1, 2048 // A_p))           # <= ~2048 rows per step
        if B >= 16:                                         # >= 2 grid steps (v7x dual TC)
            tb_cap = min(tb_cap, _round_up(-(-B // 2), 8))
        batch_tile = tb_cap
    if B <= batch_tile:
        TB = B
    else:
        TB = max(8, (batch_tile // 8) * 8)
    B_p = _round_up(B, TB)
    num_tiles = B_p // TB
    R = TB * A_p

    rep = representation.astype(f32)
    mask = atom_mask.astype(f32)
    pos = positions.astype(f32)

    # weight[b, a] = ||R_ba||^2 * mask[b, a]; mask applied before squaring -> NaN-safe for
    # non-finite padded positions (binary masks keep the original semantics).
    pos_m = jnp.where(mask[:, :, None] > 0, pos, 0.0)
    weight = jnp.sum(pos_m * pos_m, axis=-1) * mask                          # (B, A)

    pad_b, pad_a = B_p - B, A_p - A
    rep_p = jnp.pad(rep, ((0, pad_b), (0, pad_a), (0, 0)))
    weight_p = jnp.pad(weight, ((0, pad_b), (0, pad_a)))

    rep2d = rep_p.reshape(B_p * A_p, F)                                      # (B_p*A_p, F)
    wcol = weight_p.reshape(B_p * A_p, 1)                                    # (B_p*A_p, 1)
    w1f = w1.astype(f32)
    b1_2d = b1.reshape(1, H).astype(f32)
    w2row = w2.reshape(1, H).astype(f32)                                     # W2^T
    b2_2d = b2.reshape(1, 1).astype(f32)

    kernel = functools.partial(ese_kernel, tb=TB, ap=A_p)

    flops = 2 * B_p * A_p * F * H + 6 * B_p * A_p * H
    bytes_accessed = 4 * (rep2d.size + wcol.size + w1f.size + b1_2d.size
                          + w2row.size + B_p * OUT_LANES)

    y_wide = pl.pallas_call(
        kernel,
        out_shape=jax.ShapeDtypeStruct((B_p, OUT_LANES), f32),
        grid_spec=pltpu.PrefetchScalarGridSpec(
            num_scalar_prefetch=0,
            grid=(num_tiles,),
            in_specs=[
                pl.BlockSpec((R, F), lambda i: (i, 0)),                  # representation rows
                pl.BlockSpec((R, 1), lambda i: (i, 0)),                  # mask * ||R||^2
                pl.BlockSpec((F, H), lambda i: (0, 0)),                  # W1 (shared)
                pl.BlockSpec((1, H), lambda i: (0, 0)),                  # b1 (shared)
                pl.BlockSpec((1, H), lambda i: (0, 0)),                  # W2^T row (shared)
                pl.BlockSpec(memory_space=pltpu.MemorySpace.SMEM),       # b2 scalar
            ],
            out_specs=pl.BlockSpec((TB, OUT_LANES), lambda i: (i, 0)),
        ),
        compiler_params=pltpu.CompilerParams(
            dimension_semantics=("parallel",),
            vmem_limit_bytes=32 * 1024 * 1024,
        ),
        cost_estimate=pl.CostEstimate(
            flops=flops,
            transcendentals=2 * B_p * A_p * H,
            bytes_accessed=bytes_accessed,
        ),
    )(rep2d, wcol, w1f, b1_2d, w2row, b2_2d)

    return y_wide[:B, :1]


def _reference(representation, positions, atom_mask, w1, b1, w2, b2):
    h = _shifted_softplus(representation @ w1 + b1)
    charges = (h @ w2 + b2) * atom_mask[:, :, None]
    r2 = jnp.sum(positions ** 2, axis=-1, keepdims=True)
    return jnp.sum(r2 * charges, axis=1)


if __name__ == "__main__":
    key = jax.random.PRNGKey(0)

    # --- primary small test (matches the module defaults: n_in=F, hidden=F//2, out=1) ---
    B, A, F = 2, 8, 32
    H = F // 2
    kr, kp, k1, k2, k3, k4 = jax.random.split(key, 6)
    representation = jax.random.normal(kr, (B, A, F), dtype=jnp.float32)
    positions = jax.random.normal(kp, (B, A, 3), dtype=jnp.float32)
    atom_mask = jnp.ones((B, A), dtype=jnp.float32).at[1, -2:].set(0.0)
    w1 = jax.random.normal(k1, (F, H), dtype=jnp.float32) * 0.1
    b1 = jax.random.normal(k2, (H,), dtype=jnp.float32) * 0.1
    w2 = jax.random.normal(k3, (H, 1), dtype=jnp.float32) * 0.1
    b2 = jax.random.normal(k4, (1,), dtype=jnp.float32) * 0.1

    y = electronic_spatial_extent(representation, positions, atom_mask, w1, b1, w2, b2)
    y = jax.block_until_ready(y)
    y_ref = _reference(representation, positions, atom_mask, w1, b1, w2, b2)
    assert y.shape == (B, 1)
    assert jnp.allclose(y, y_ref, atol=1e-4, rtol=1e-4), (y, y_ref)

    # --- secondary test: ragged sizes exercise atom/batch padding and a multi-tile grid ---
    B2, A2 = 20, 5
    kr2, kp2, km2 = jax.random.split(jax.random.PRNGKey(1), 3)
    rep2 = jax.random.normal(kr2, (B2, A2, F), dtype=jnp.float32)
    pos2 = jax.random.normal(kp2, (B2, A2, 3), dtype=jnp.float32)
    mask2 = (jax.random.uniform(km2, (B2, A2)) > 0.3).astype(jnp.float32)
    y2 = electronic_spatial_extent(rep2, pos2, mask2, w1, b1, w2, b2)
    y2 = jax.block_until_ready(y2)
    y2_ref = _reference(rep2, pos2, mask2, w1, b1, w2, b2)
    assert y2.shape == (B2, 1)
    assert jnp.allclose(y2, y2_ref, atol=1e-4, rtol=1e-4), (y2, y2_ref)

    print("KERNEL_OK")
</pallas_src>

<mosaic_0001>
module attributes {stable_mosaic.version = 11 : i64} {
  func.func @ese_kernel(%arg0: i32, %arg1: memref<16x32xf32, #tpu.memory_space<vmem>>, %arg2: memref<16x1xf32, #tpu.memory_space<vmem>>, %arg3: memref<32x16xf32, #tpu.memory_space<vmem>>, %arg4: memref<1x16xf32, #tpu.memory_space<vmem>>, %arg5: memref<1x16xf32, #tpu.memory_space<vmem>>, %arg6: memref<1x1xf32, #tpu.memory_space<smem>>, %arg7: memref<2x128xf32, #tpu.memory_space<vmem>>) attributes {dimension_semantics = [#tpu.dimension_semantics<parallel>], iteration_bounds = array<i64: 1>, scalar_prefetch = 0 : i64, scratch_operands = 0 : i64, tpu.core_type = #tpu.core_type<tc>, window_params = [{transform_indices = @transform_0, window_bounds = array<i64: 16, 32>}, {transform_indices = @transform_1, window_bounds = array<i64: 16, 1>}, {pipeline_mode = #tpu.pipeline_mode<synchronous>, transform_indices = @transform_2, window_bounds = array<i64: 32, 16>}, {pipeline_mode = #tpu.pipeline_mode<synchronous>, transform_indices = @transform_3, window_bounds = array<i64: 1, 16>}, {pipeline_mode = #tpu.pipeline_mode<synchronous>, transform_indices = @transform_4, window_bounds = array<i64: 1, 16>}, {transform_indices = @transform_5, window_bounds = array<i64: 1, 1>}, {transform_indices = @transform_6, window_bounds = array<i64: 2, 128>}]} {
    %c0 = arith.constant 0 : index
    %c0_0 = arith.constant 0 : index
    %0 = vector.load %arg1[%c0, %c0_0] : memref<16x32xf32, #tpu.memory_space<vmem>>, vector<16x32xf32>
    %c0_1 = arith.constant 0 : index
    %c0_2 = arith.constant 0 : index
    %1 = vector.load %arg3[%c0_1, %c0_2] : memref<32x16xf32, #tpu.memory_space<vmem>>, vector<32x16xf32>
    %cst = arith.constant dense<0.000000e+00> : vector<16x16xf32>
    %2 = tpu.matmul %0, %1, %cst {dimension_numbers = #tpu.dot_dimension_numbers<[1], [0], [0], [1], [0, 0, 1, 1], [], []>} : vector<16x32xf32>, vector<32x16xf32>, vector<16x16xf32> -> vector<16x16xf32>
    %c0_3 = arith.constant 0 : index
    %c0_4 = arith.constant 0 : index
    %3 = vector.load %arg4[%c0_3, %c0_4] : memref<1x16xf32, #tpu.memory_space<vmem>>, vector<1x16xf32>
    %4 = vector.broadcast %3 : vector<1x16xf32> to vector<16x16xf32>
    %5 = arith.addf %2, %4 : vector<16x16xf32>
    %cst_5 = arith.constant 0.000000e+00 : f32
    %6 = vector.broadcast %cst_5 : f32 to vector<16x16xf32>
    %7 = arith.maximumf %5, %6 : vector<16x16xf32>
    %8 = math.absf %5 : vector<16x16xf32>
    %cst_6 = arith.constant 0.000000e+00 : f32
    %9 = vector.broadcast %cst_6 : f32 to vector<16x16xf32>
    %10 = arith.subf %9, %8 : vector<16x16xf32>
    %11 = math.exp %10 : vector<16x16xf32>
    %12 = math.log1p %11 : vector<16x16xf32>
    %13 = arith.addf %7, %12 : vector<16x16xf32>
    %cst_7 = arith.constant 0.693147182 : f32
    %14 = vector.broadcast %cst_7 : f32 to vector<16x16xf32>
    %15 = arith.subf %13, %14 : vector<16x16xf32>
    %c0_8 = arith.constant 0 : index
    %c0_9 = arith.constant 0 : index
    %16 = vector.load %arg5[%c0_8, %c0_9] : memref<1x16xf32, #tpu.memory_space<vmem>>, vector<1x16xf32>
    %17 = vector.broadcast %16 : vector<1x16xf32> to vector<16x16xf32>
    %18 = arith.mulf %15, %17 : vector<16x16xf32>
    %cst_10 = arith.constant dense<0.000000e+00> : vector<16xf32>
    %19 = vector.multi_reduction <add>, %18, %cst_10 [1] : vector<16x16xf32> to vector<16xf32>
    %20 = vector.shape_cast %19 : vector<16xf32> to vector<16x1xf32>
    %c0_11 = arith.constant 0 : index
    %c0_12 = arith.constant 0 : index
    %21 = memref.load %arg6[%c0_11, %c0_12] : memref<1x1xf32, #tpu.memory_space<smem>>
    %22 = vector.broadcast %21 : f32 to vector<16x1xf32>
    %23 = arith.addf %20, %22 : vector<16x1xf32>
    %c0_13 = arith.constant 0 : index
    %c0_14 = arith.constant 0 : index
    %24 = vector.load %arg2[%c0_13, %c0_14] : memref<16x1xf32, #tpu.memory_space<vmem>>, vector<16x1xf32>
    %25 = arith.mulf %23, %24 : vector<16x1xf32>
    %26 = vector.shape_cast %25 : vector<16x1xf32> to vector<2x8x1xf32>
    %cst_15 = arith.constant dense<0.000000e+00> : vector<2x1xf32>
    %27 = vector.multi_reduction <add>, %26, %cst_15 [1] : vector<2x8x1xf32> to vector<2x1xf32>
    %28 = vector.shape_cast %27 : vector<2x1xf32> to vector<2x1xf32>
    %29 = vector.broadcast %28 : vector<2x1xf32> to vector<2x128xf32>
    %c0_16 = arith.constant 0 : index
    %c0_17 = arith.constant 0 : index
    %30 = vector.load %arg7[%c0_16, %c0_17] : memref<2x128xf32, #tpu.memory_space<vmem>>, vector<2x128xf32>
    tpu.vector_store %arg7[%c0_16, %c0_17], %29 {strides = array<i32>} : memref<2x128xf32, #tpu.memory_space<vmem>>, vector<2x128xf32>,
    return
  }
  func.func @transform_0(%arg0: i32) -> (i32, i32) {
    %c0_i32 = arith.constant 0 : i32
    %c0_i32_0 = arith.constant 0 : i32
    return %arg0, %c0_i32 : i32, i32
  }
  func.func @transform_1(%arg0: i32) -> (i32, i32) {
    %c0_i32 = arith.constant 0 : i32
    %c0_i32_0 = arith.constant 0 : i32
    return %arg0, %c0_i32 : i32, i32
  }
  func.func @transform_2(%arg0: i32) -> (i32, i32) {
    %c0_i32 = arith.constant 0 : i32
    %c0_i32_0 = arith.constant 0 : i32
    %c0_i32_1 = arith.constant 0 : i32
    return %c0_i32, %c0_i32_0 : i32, i32
  }
  func.func @transform_3(%arg0: i32) -> (i32, i32) {
    %c0_i32 = arith.constant 0 : i32
    %c0_i32_0 = arith.constant 0 : i32
    %c0_i32_1 = arith.constant 0 : i32
    return %c0_i32, %c0_i32_0 : i32, i32
  }
  func.func @transform_4(%arg0: i32) -> (i32, i32) {
    %c0_i32 = arith.constant 0 : i32
    %c0_i32_0 = arith.constant 0 : i32
    %c0_i32_1 = arith.constant 0 : i32
    return %c0_i32, %c0_i32_0 : i32, i32
  }
  func.func @transform_5(%arg0: i32) -> (i32, i32) {
    %c0_i32 = arith.constant 0 : i32
    %c0_i32_0 = arith.constant 0 : i32
    %c0_i32_1 = arith.constant 0 : i32
    return %c0_i32, %c0_i32_0 : i32, i32
  }
  func.func @transform_6(%arg0: i32) -> (i32, i32) {
    %c0_i32 = arith.constant 0 : i32
    %c0_i32_0 = arith.constant 0 : i32
    return %arg0, %c0_i32 : i32, i32
  }
}

</mosaic_0001>

<bundles_post_ra>
// kernel: tpu_custom_call.1
= control target key start
LH: loop header
LB: loop body
LE: loop exit
PB: predicated region body
PF: predicated region fallthrough
CT: control target
= control target key end

     0   :  { %vm38_vm0 = vcmask 261120   ;;  %s347_s0 = inlined_call_operand.vmem [shape: f32[16,32], index: 0, kind: input, shape index: {}]   ;;  %s348_s1 = inlined_call_operand.vmem [shape: f32[16,1], index: 1, kind: input, shape index: {}]   ;;  %s349_s2 = inlined_call_operand.vmem [shape: f32[32,16], index: 2, kind: input, shape index: {}]   ;;  %s350_s3 = inlined_call_operand.vmem [shape: f32[1,16], index: 3, kind: input, shape index: {}]   ;;  %s351_s4 = inlined_call_operand.vmem [shape: f32[1,16], index: 4, kind: input, shape index: {}]   ;;  %s352_s5 = inlined_call_operand.<no memory space> [shape: f32[1,1], index: 5, kind: input, shape index: {}]   ;;  %s353_s6 = inlined_call_operand.hbm [shape: f32[2,128], index: 6, kind: output, shape index: {}]  }
   0x1   :  { %v30_v0 = vld [vmem:[%s349_s2 + $0x18] sm:$0xff]  ;;  %v29_v1 = vld [vmem:[%s349_s2 + $0x10] sm:$0xff]  ;;  %v25_v2 = vld [vmem:[%s347_s0] sm:$0xff] }
   0x2   :  { %229 = vmatprep.subr.mxu0 %v30_v0  ;;  %v28_v3 = vld [vmem:[%s349_s2 + $0x8] sm:$0xff]  ;;  %237 = vmatprep.mubr.msk.f32.mxu0 %vm38_vm0, %v25_v2 }
   0x3   :  { %230 = vmatpush3.msra.mxu0 %v30_v0 }
   0x4   :  { %12 = vsyncpa [#allocation4], 0  ;;  %231 = vmatprep.subr.mxu0 %v29_v1  ;;  %v27_v4 = vld [vmem:[%s349_s2] sm:$0xff]  ;;  %v26_v5 = vld [vmem:[%s347_s0 + $0x8] sm:$0xff]  ;;  %vm161_vm3 = vcmask 130048   ;;  %v274_v46 = vmov 0   ;;  %v169_v47 = vstv %s352_s5 }
   0x5   :  { %232 = vmatpush3.msra.mxu0 %v29_v1  ;;  %v217_v6 = vld [vmem:[%s350_s3] ss:$0 sm:$0xff]  ;;  %242 = vset.pattern.permute.xlu1 %v274_v46  ;;  %vm176_vm4 = vcmask 7168   ;;  %v173_v52 = vld [vmem:[%s348_s1 + $0x8] sm:$0xff]  ;;  %vm199_vm5 = vcmask 1041409  }
   0x6   :  { %233 = vmatprep.subr.mxu0 %v28_v3  ;;  %v222_v41 = vld [vmem:[%s351_s4] ss:$0 sm:$0xff]  ;;  %243 = vset.pattern.permute.xlu0 %v274_v46 }
   0x7   :  { %234 = vmatpush3.msra.mxu0 %v28_v3  ;;  %v172_v48 = vld [vmem:[%s348_s1] sm:$0xff]  ;;  %s275_s1 = smov [#allocation3]  }
   0x8   :  { %235 = vmatprep.subr.mxu0 %v27_v4  ;;  %s209_s5 = sshll.u32 %s275_s1, 4  ;;  %s210_s5 = int_to_ptr.vmem [resolvable:$true] %s209_s5 }
   0x9   :  { %236 = vmatpush3.msra.mxu0 %v27_v4  ;;  %s252_s15 = scalar_lea.vmem %s210_s5, 32  ;;  %p257_p1 = scmp.lt.s32.totalorder %s210_s5, %s210_s5 }
   0xa   :  { %238 = vmatmul.mubr.msk.f32.vlgmr.msra.gmra.mxu0 %vm38_vm0, %v26_v5  ;;  %p253_p0 = scmp.ne.s32.totalorder %s210_s5, %s252_s15  ;;  %p258_p2 = scmp.lt.s32.totalorder %s252_s15, %s252_s15 }
   0xc   :  { %p259_p3 = por %p258_p2, %p257_p1 }
   0xe   :  { %p260_p4 = pnand %p259_p3, %p253_p0 }
  0xca   :  { %v239_v7 = vpop.f32.mrf.mxu0 }
  0xcb   :  { %v117_v8 = vadd.f32 %v239_v7, %v217_v6 }
  0xcc   :  { %v111_v9 = vpop.f32.mrf.mxu0 }
  0xcd   :  { %v123_v10 = vand.u32 2147483647, %v117_v8  ;;  %v112_v11 = vadd.f32 %v217_v6, %v111_v9  ;;  %v121_v31 = vmax.f32 %v117_v8, 0.0 }
  0xcf   :  { %v125_v12 = vsub.f32 0.0, %v123_v10  ;;  %v122_v13 = vand.u32 2147483647, %v112_v11  ;;  %v120_v36 = vmax.f32 %v112_v11, 0.0 }
  0xd1   :  { %v128_v14 = vmul.f32 1.442695, %v125_v12  ;;  %v124_v15 = vsub.f32 0.0, %v122_v13 }
  0xd3   :  { %244 = vpow2.f32 %v128_v14  ;;  %v126_v16 = vmul.f32 1.442695, %v124_v15 }
  0xd5   :  { %246 = vpow2.f32 %v126_v16 }
  0xe0   :  { %v245_v17 = vpop.eup %244 }
  0xe1   :  { %v139_v18 = vadd.f32 1.0, %v245_v17  ;;  %v142_v21 = vmul.f32 -0.5, %v245_v17  ;;  %v145_v24 = vand.u32 2147483647, %v245_v17 }
  0xe2   :  { %v247_v19 = vpop.eup %246 }
  0xe3   :  { %248 = vlog2.f32 %v139_v18  ;;  %v130_v20 = vadd.f32 1.0, %v247_v19  ;;  %v133_v22 = vmul.f32 -0.5, %v247_v19  ;;  %v143_v23 = vadd.f32 1.0, %v142_v21 }
  0xe4   :  { %v136_v27 = vand.u32 2147483647, %v247_v19  ;;  %vm146_vm1 = vcmp.lt.f32.partialorder %v145_v24, 0.0004427343 }
  0xe5   :  { %250 = vlog2.f32 %v130_v20  ;;  %v134_v25 = vadd.f32 1.0, %v133_v22  ;;  %v144_v29 = vmul.f32 %v245_v17, %v143_v23 }
  0xe6   :  { %vm137_vm2 = vcmp.lt.f32.partialorder %v136_v27, 0.0004427343 }
  0xe7   :  { %v135_v34 = vmul.f32 %v247_v19, %v134_v25 }
  0xf0   :  { %v249_v26 = vpop.eup %248 }
  0xf1   :  { %v141_v28 = vmul.f32 0.6931472, %v249_v26 }
  0xf2   :  { %v251_v30 = vpop.eup %250 }
  0xf3   :  { %v147_v32 = vsel %vm146_vm1, %v144_v29, %v141_v28  ;;  %v132_v33 = vmul.f32 0.6931472, %v251_v30 }
  0xf4   :  { %v149_v35 = vadd.f32 %v147_v32, %v121_v31 }
  0xf5   :  { %v138_v37 = vsel %vm137_vm2, %v135_v34, %v132_v33 }
  0xf6   :  { %v148_v38 = vadd.f32 %v138_v37, %v120_v36  ;;  %v221_v40 = vadd.f32 -0.6931472, %v149_v35 }
  0xf8   :  { %v220_v39 = vadd.f32 -0.6931472, %v148_v38  ;;  %v160_v44 = vmul.f32 %v222_v41, %v221_v40 }
  0xfa   :  { %v159_v42 = vmul.f32 %v222_v41, %v220_v39  ;;  %v165_v45 = vsel %vm161_vm3, %v160_v44, 0.0 }
  0xfc   :  { %v162_v43 = vsel %vm161_vm3, %v159_v42, 0.0 }
  0xfd   :  { %163 = vadd.xlane.f32.xlu0 %v162_v43 }
 0x101   :  { %166 = vadd.xlane.f32.xlu0 %v165_v45 }
 0x186   :  { %v164_v49 = vpop.xlane.xlu0 %163 }
 0x187   :  { %v170_v50 = vadd.f32 %v169_v47, %v164_v49 }
 0x189   :  { %v174_v51 = vmul.f32 %v172_v48, %v170_v50 }
 0x18a   :  { %v167_v53 = vpop.xlane.xlu0 %166 }
 0x18b   :  { %v177_v54 = vsel %vm176_vm4, %v174_v51, 0.0  ;;  %v171_v55 = vadd.f32 %v169_v47, %v167_v53 }
 0x18c   :  { %v178_v56 = vrot.slane %v177_v54, 4 }
 0x18d   :  { %v175_v57 = vmul.f32 %v173_v52, %v171_v55 }
 0x18e   :  { %v179_v58 = vadd.f32 %v178_v56, %v177_v54 }
 0x18f   :  { %v184_v59 = vsel %vm176_vm4, %v175_v57, 0.0 }
 0x190   :  { %v185_v60 = vrot.slane %v184_v59, 4  ;;  %v180_v61 = vrot.slane %v179_v58, 2 }
 0x192   :  { %v186_v62 = vadd.f32 %v185_v60, %v184_v59  ;;  %v181_v63 = vadd.f32 %v180_v61, %v179_v58 }
 0x194   :  { %v187_v0 = vrot.slane %v186_v62, 2  ;;  %v182_v1 = vrot.slane %v181_v63, 1 }
 0x196   :  { %v183_v2 = vadd.f32 %v182_v1, %v181_v63  ;;  %v188_v3 = vadd.f32 %v187_v0, %v186_v62 }
 0x198   :  { %193 = vperm.xlu1 %242, %v183_v2   ;;  %v189_v4 = vrot.slane %v188_v3, 1 }
 0x19a   :  { %v190_v5 = vadd.f32 %v189_v4, %v188_v3 }
 0x19c   :  { %197 = vperm.xlu1 %242, %v190_v5  }
 0x213   :  { %v194_v6 = vpop.permute.xlu1 %193 }
 0x217   :  { %v198_v7 = vpop.permute.xlu1 %197 }
 0x218   :  { %v200_v8 = vsel %vm199_vm5, %v198_v7, %v194_v6 }
 0x219   :  { %202 = vst [vmem:[#allocation3] sm:$0x3] %v200_v8 }
 0x21a   :  { %263 = shalt.err (!%p260_p4)
}
 0x21b   :  { %212 = dma.vmem_to_hbm [thread:$0]  %s210_s5, 32, %s353_s6, [#allocation4]  }
 0x21c   :  { %272 = dma.done.wait [#allocation4], 32  }
 0x21d   :  { %273 = vsyncadd [#allocation4], 4294967264 }
 0x21e   :  { %216 = vsyncpa [#allocation4], 1 }

</bundles_post_ra>
